<compile_context>
chip_gen: v6e
topology: v6e:2x2x1
jax: 0.10.0
libtpu: 0.0.40
codegen_flags: <defaults>
</compile_context>

<pallas_src>
import numpy as np
import jax
import jax.numpy as jnp
from jax import lax
from jax.experimental import pallas as pl
from jax.experimental.pallas import tpu as pltpu

KH, KW = 2, 2
C_OUT = 7


def _pointwise_chain(x1):
    # exactly the forward's elementwise tail
    x2 = x1 * 0.5
    x3 = x1 * x1 * x1
    x4 = x3 * 0.044715
    x5 = x1 + x4
    x6 = x5 * 0.7978845608028654
    x7 = jnp.tanh(x6)
    x8 = x7 + 1.0
    return x2 * x8


def _kernel(x_lhs_ref, w_mat_ref, bias_ref, s_ref, mp_ref, o_ref):
    # x_lhs_ref: (N*C_OUT, H*W)       batch-flipped, row-replicated input pixels
    # w_mat_ref: (N*C_OUT, 4)          per-row conv-transpose taps (kh, kw) row-major
    # bias_ref : (N*C_OUT, 1)          per-row bias column
    # s_ref    : (H*W, H2*W2)          0/1 selection: upsample x2 + width flip
    # mp_ref   : (4, H2*W2)            0/1 tap-parity masks (flip-adjusted)
    # o_ref    : (N*C_OUT, H2*W2)      final flattened output slab
    hp = lax.Precision.HIGHEST
    f32 = jnp.float32

    # Two exact MXU pushes; every output element is exactly one f32 value * 1.0.
    xup = jnp.dot(x_lhs_ref[...], s_ref[...], precision=hp, preferred_element_type=f32)
    wm = jnp.dot(w_mat_ref[...], mp_ref[...], precision=hp, preferred_element_type=f32)

    pre = xup * wm + bias_ref[...]          # (N*C_OUT, 1) broadcasts along lanes
    o_ref[...] = _pointwise_chain(pre)


def _selection_constants(H, W):
    """Host-side 0/1 constants; exact, depend only on static shapes."""
    H2, W2 = KH * H, KW * W
    HW, HW2 = H * W, H2 * W2
    c = np.arange(HW2)
    i = c // W2                       # output row within the (H2, W2) image
    j = c % W2                        # output col within the (H2, W2) image
    # conv-transpose with stride == kernel == 2 has no overlapping taps:
    #   out[i, j]  (after width flip)  reads  x[i//2, W-1 - j//2]  with tap
    #   (kh, kw') = (i % 2, 1 - j % 2)
    p_src = (i // 2) * W + ((W - 1) - (j // 2))
    S = np.zeros((HW, HW2), np.float32)
    S[p_src, c] = 1.0
    tap = (i % 2) * KW + (1 - (j % 2))
    MP = np.zeros((KH * KW, HW2), np.float32)
    MP[tap, c] = 1.0
    return S, MP


@jax.jit
def model_forward(x, weight, bias):
    """x: (N, 1, H, W) f32; weight: (1, C_OUT, KH, KW) f32; bias: (C_OUT,) f32."""
    N, cin, H, W = x.shape
    assert cin == 1
    H2, W2 = KH * H, KW * W
    HW, HW2 = H * W, H2 * W2
    R = N * C_OUT

    S_np, MP_np = _selection_constants(H, W)
    S = jnp.asarray(S_np)
    MP = jnp.asarray(MP_np)

    # Tiny wrapper-side layout plumbing (batch flip + row replication/tiling).
    x_lhs = jnp.repeat(jnp.flip(x[:, 0], axis=0).reshape(N, HW), C_OUT, axis=0)  # (R, HW)
    w_mat = jnp.tile(weight[0].reshape(C_OUT, KH * KW), (N, 1))                  # (R, 4)
    bias_col = jnp.tile(bias, N).reshape(R, 1)                                   # (R, 1)

    flat = pl.pallas_call(
        _kernel,
        out_shape=jax.ShapeDtypeStruct((R, HW2), jnp.float32),
        in_specs=[
            pl.BlockSpec(memory_space=pltpu.MemorySpace.VMEM),   # x_lhs
            pl.BlockSpec(memory_space=pltpu.MemorySpace.VMEM),   # w_mat
            pl.BlockSpec(memory_space=pltpu.MemorySpace.VMEM),   # bias column
            pl.BlockSpec(memory_space=pltpu.MemorySpace.VMEM),   # S
            pl.BlockSpec(memory_space=pltpu.MemorySpace.VMEM),   # MP
        ],
        out_specs=pl.BlockSpec(memory_space=pltpu.MemorySpace.VMEM),
    )(x_lhs, w_mat, bias_col, S, MP)

    # Contiguous reshape back to the module's output layout (free).
    return flat.reshape(N, C_OUT, H2, W2)


def _reference(x, weight, bias):
    # pure-JAX reference matching the PyTorch forward (with the groups=1 fix)
    N, _, H, W = x.shape
    y = (x[:, 0][:, None, :, None, :, None] *
         weight[0][None, :, None, :, None, :])      # (N, C_OUT, H, KH, W, KW)
    y = y + bias[None, :, None, None, None, None]
    y = y.reshape(N, C_OUT, H * KH, W * KW)
    y = jnp.flip(y, (0, 3))
    return _pointwise_chain(y)


if __name__ == "__main__":
    key = jax.random.PRNGKey(0)
    kx, kw, kb = jax.random.split(key, 3)

    x1 = jax.random.normal(kx, (2, 1, 7, 13), dtype=jnp.float32)
    # deterministic param init (ConvTranspose2d weight shape: (in, out, kH, kW))
    fan = 1 * KH * KW
    bound = 1.0 / (fan ** 0.5)
    weight = jax.random.uniform(kw, (1, C_OUT, KH, KW), jnp.float32, -bound, bound)
    bias = jax.random.uniform(kb, (C_OUT,), jnp.float32, -bound, bound)

    out = jax.block_until_ready(model_forward(x1, weight, bias))
    ref = jax.block_until_ready(_reference(x1, weight, bias))

    assert out.shape == (2, 7, 14, 26), out.shape
    assert jnp.allclose(out, ref, atol=1e-5, rtol=1e-5), "mismatch vs reference"
    print("KERNEL_OK")
</pallas_src>

<mosaic_0001>
module attributes {stable_mosaic.version = 11 : i64} {
  func.func @_kernel(%arg0: memref<14x91xf32, #tpu.memory_space<vmem>>, %arg1: memref<14x4xf32, #tpu.memory_space<vmem>>, %arg2: memref<14x1xf32, #tpu.memory_space<vmem>>, %arg3: memref<91x364xf32, #tpu.memory_space<vmem>>, %arg4: memref<4x364xf32, #tpu.memory_space<vmem>>, %arg5: memref<14x364xf32, #tpu.memory_space<vmem>>) attributes {dimension_semantics = [], scalar_prefetch = 0 : i64, scratch_operands = 0 : i64, tpu.core_type = #tpu.core_type<tc>} {
    %c0 = arith.constant 0 : index
    %c0_0 = arith.constant 0 : index
    %0 = vector.load %arg0[%c0, %c0_0] : memref<14x91xf32, #tpu.memory_space<vmem>>, vector<14x91xf32>
    %c0_1 = arith.constant 0 : index
    %c0_2 = arith.constant 0 : index
    %1 = vector.load %arg3[%c0_1, %c0_2] : memref<91x364xf32, #tpu.memory_space<vmem>>, vector<91x364xf32>
    %cst = arith.constant dense<0.000000e+00> : vector<14x364xf32>
    %2 = tpu.matmul %0, %1, %cst {dimension_numbers = #tpu.dot_dimension_numbers<[1], [0], [0], [1], [0, 0, 1, 1], [], []>, precision = #tpu.contract_precision<fp32>} : vector<14x91xf32>, vector<91x364xf32>, vector<14x364xf32> -> vector<14x364xf32>
    %c0_3 = arith.constant 0 : index
    %c0_4 = arith.constant 0 : index
    %3 = vector.load %arg1[%c0_3, %c0_4] : memref<14x4xf32, #tpu.memory_space<vmem>>, vector<14x4xf32>
    %c0_5 = arith.constant 0 : index
    %c0_6 = arith.constant 0 : index
    %4 = vector.load %arg4[%c0_5, %c0_6] : memref<4x364xf32, #tpu.memory_space<vmem>>, vector<4x364xf32>
    %cst_7 = arith.constant dense<0.000000e+00> : vector<14x364xf32>
    %5 = tpu.matmul %3, %4, %cst_7 {dimension_numbers = #tpu.dot_dimension_numbers<[1], [0], [0], [1], [0, 0, 1, 1], [], []>, precision = #tpu.contract_precision<fp32>} : vector<14x4xf32>, vector<4x364xf32>, vector<14x364xf32> -> vector<14x364xf32>
    %6 = arith.mulf %2, %5 : vector<14x364xf32>
    %c0_8 = arith.constant 0 : index
    %c0_9 = arith.constant 0 : index
    %7 = vector.load %arg2[%c0_8, %c0_9] : memref<14x1xf32, #tpu.memory_space<vmem>>, vector<14x1xf32>
    %8 = vector.broadcast %7 : vector<14x1xf32> to vector<14x364xf32>
    %9 = arith.addf %6, %8 : vector<14x364xf32>
    %cst_10 = arith.constant 5.000000e-01 : f32
    %10 = vector.broadcast %cst_10 : f32 to vector<14x364xf32>
    %11 = arith.mulf %9, %10 : vector<14x364xf32>
    %12 = arith.mulf %9, %9 : vector<14x364xf32>
    %13 = arith.mulf %12, %9 : vector<14x364xf32>
    %cst_11 = arith.constant 4.471500e-02 : f32
    %14 = vector.broadcast %cst_11 : f32 to vector<14x364xf32>
    %15 = arith.mulf %13, %14 : vector<14x364xf32>
    %16 = arith.addf %9, %15 : vector<14x364xf32>
    %cst_12 = arith.constant 0.797884583 : f32
    %17 = vector.broadcast %cst_12 : f32 to vector<14x364xf32>
    %18 = arith.mulf %16, %17 : vector<14x364xf32>
    %19 = math.tanh %18 : vector<14x364xf32>
    %cst_13 = arith.constant 1.000000e+00 : f32
    %20 = vector.broadcast %cst_13 : f32 to vector<14x364xf32>
    %21 = arith.addf %19, %20 : vector<14x364xf32>
    %22 = arith.mulf %11, %21 : vector<14x364xf32>
    %c0_14 = arith.constant 0 : index
    %c0_15 = arith.constant 0 : index
    %23 = vector.load %arg5[%c0_14, %c0_15] : memref<14x364xf32, #tpu.memory_space<vmem>>, vector<14x364xf32>
    tpu.vector_store %arg5[%c0_14, %c0_15], %22 {strides = array<i32>} : memref<14x364xf32, #tpu.memory_space<vmem>>, vector<14x364xf32>,
    return
  }
}

</mosaic_0001>

<bundles_post_ra>
// kernel: tile.16
= control target key start
LH: loop header
LB: loop body
LE: loop exit
PB: predicated region body
PF: predicated region fallthrough
CT: control target
= control target key end

     0   :  { %s22_s0 = inlined_call_operand.vmem [shape: f32[7], index: 0, kind: input, shape index: {}]   ;;  %s23_s1 = inlined_call_operand.vmem [shape: f32[2,7], index: 1, kind: output, shape index: {}]  }
   0x1   :  { %v4_v0 = vld [vmem:[%s22_s0] ss:$0 sm:$0xff] }
   0x2   :  { %5 = vst [vmem:[%s23_s1] sm:$0x3] %v4_v0 }

// kernel: tile.12
= control target key start
LH: loop header
LB: loop body
LE: loop exit
PB: predicated region body
PF: predicated region fallthrough
CT: control target
= control target key end

     0   :  { %vm22_vm0 = vcmask 56320   ;;  %vm28_vm1 = vcmask 113720   ;;  %s70_s0 = inlined_call_operand.vmem [shape: f32[2,7,4], index: 0, kind: input, shape index: {}]   ;;  %s71_s1 = inlined_call_operand.vmem [shape: f32[14,4], index: 1, kind: output, shape index: {}]  }
   0x1   :  { %v40_v0 = vld [vmem:[%s70_s0 + $0x6] sm:$0x3]  ;;  %v41_v1 = vld [vmem:[%s70_s0 + $0x4] sm:$0x3]  ;;  %v42_v2 = vld [vmem:[%s70_s0 + $0x2] sm:$0x3] }
   0x2   :  { %9 = vst [vmem:[#allocation1 + $0x18] sm:$0x3] %v40_v0  ;;  %14 = vst [vmem:[#allocation1 + $0x10] sm:$0x3] %v41_v1  ;;  %v19_v3 = vld [vmem:[%s70_s0] sm:$0x3] }
   0x3   :  { %18 = vst [vmem:[#allocation1 + $0x8] sm:$0x3] %v42_v2  ;;  %20 = vst [vmem:[#allocation1] sm:$0x3] %v19_v3  ;;  %s44_s0 = smov 7  }
   0xa   :  { %v25_v4 = vld [vmem:[#allocation1 + $0x1] ss:$8 sm:$0xf]   ;;  %v21_v5 = vld [vmem:[#allocation1] ss:$8 sm:$0xf]  }
   0xb   :  { %26 = vrot.lane.b32.xlu0 %v25_v4, %s44_s0  ;;  %23 = vst.msk [vmem:[#allocation0] sm:$0xf] %vm22_vm0, %v21_v5  }
  0x7d   :  { %v27_v6 = vpop.permute.xlu0 %26  }
  0x7e   :  { %29 = vst.msk [vmem:[#allocation0] sm:$0xf] %vm28_vm1, %v27_v6  }
  0x85   :  { %v34_v7 = vld [vmem:[#allocation0] sm:$0xf] }
  0x86   :  { %37 = vst [vmem:[%s71_s1] sm:$0xf] %v34_v7 }

// kernel: tile.0
= control target key start
LH: loop header
LB: loop body
LE: loop exit
PB: predicated region body
PF: predicated region fallthrough
CT: control target
= control target key end

     0   :  { %s59_s8 = smov 127   ;;  %vm8_vm0 = vcmask 7168   ;;  %s60_s11 = smov 124   ;;  %s105_s0 = inlined_call_operand.vmem [shape: f32[2,7], index: 0, kind: input, shape index: {}]   ;;  %s106_s1 = inlined_call_operand.vmem [shape: f32[14,1], index: 1, kind: output, shape index: {}]  }
   0x1   :  { %v5_v0 = vld [vmem:[%s105_s0] sm:$0x3]  ;;  %s58_s0 = smov 125   ;;  %s61_s12 = smov 126  }
   0x2   :  { %6 = vst [vmem:[#allocation0] sm:$0x3] %v5_v0  ;;  %s62_s13 = smov 122   ;;  %s63_s14 = smov 123  }
   0x9   :  { %v22_v1 = vld [vmem:[#allocation0] sm:$0x3]  }
   0xa   :  { %v10_v2 = vld [vmem:[#allocation0] sm:$0x3]   ;;  %23 = vrot.lane.b32.xlu1 %v22_v1, %s58_s0 }
   0xb   :  { %11 = vrot.lane.b32.xlu0 %v10_v2, %s59_s8  ;;  %v28_v3 = vld [vmem:[#allocation0] sm:$0x3]  }
   0xc   :  { %v16_v4 = vld [vmem:[#allocation0] sm:$0x3]  }
   0xd   :  { %v7_v5 = vld [vmem:[#allocation0] sm:$0x3]  }
   0xe   :  { %9 = vst.msk [vmem:[%s106_s1] ss:$7 sm:$0x3] %vm8_vm0, %v7_v5   ;;  %29 = vrot.lane.b32.xlu1 %v28_v3, %s60_s11  ;;  %v40_v6 = vld [vmem:[#allocation0] sm:$0x3]  }
   0xf   :  { %17 = vrot.lane.b32.xlu0 %v16_v4, %s61_s12  ;;  %v34_v7 = vld [vmem:[#allocation0] sm:$0x3]  }
  0x12   :  { %41 = vrot.lane.b32.xlu1 %v40_v6, %s62_s13 }
  0x13   :  { %35 = vrot.lane.b32.xlu0 %v34_v7, %s63_s14 }
  0x7c   :  { %v24_v8 = vpop.permute.xlu1 %23  }
  0x7d   :  { %v12_v9 = vpop.permute.xlu0 %11   ;;  %48 = vst.msk [vmem:[%s106_s1 + $0x3] ss:$7 sm:$0x3] %vm8_vm0, %v24_v8  }
  0x7e   :  { %46 = vst.msk [vmem:[%s106_s1 + $0x1] ss:$7 sm:$0x3] %vm8_vm0, %v12_v9  }
  0x80   :  { %v30_v10 = vpop.permute.xlu1 %29  }
  0x81   :  { %v18_v11 = vpop.permute.xlu0 %17   ;;  %49 = vst.msk [vmem:[%s106_s1 + $0x4] ss:$7 sm:$0x3] %vm8_vm0, %v30_v10  }
  0x82   :  { %47 = vst.msk [vmem:[%s106_s1 + $0x2] ss:$7 sm:$0x3] %vm8_vm0, %v18_v11  }
  0x84   :  { %v42_v12 = vpop.permute.xlu1 %41  }
  0x85   :  { %v36_v13 = vpop.permute.xlu0 %35   ;;  %51 = vst.msk [vmem:[%s106_s1 + $0x6] ss:$7 sm:$0x3] %vm8_vm0, %v42_v12  }
  0x86   :  { %50 = vst.msk [vmem:[%s106_s1 + $0x5] ss:$7 sm:$0x3] %vm8_vm0, %v36_v13  }

// kernel: model_forward.1
= control target key start
LH: loop header
LB: loop body
LE: loop exit
PB: predicated region body
PF: predicated region fallthrough
CT: control target
= control target key end

     0   :  { %10 = vsyncpa [#allocation3], 0  ;;  %s2971_s18 = smov [#allocation2]   ;;  %s3960_s0 = inlined_call_operand.vmem [shape: f32[14,91], index: 0, kind: input, shape index: {}]   ;;  %s3961_s1 = inlined_call_operand.vmem [shape: f32[14,4], index: 1, kind: input, shape index: {}]   ;;  %s3962_s2 = inlined_call_operand.vmem [shape: f32[14,1], index: 2, kind: input, shape index: {}]   ;;  %s3963_s3 = inlined_call_operand.hbm [shape: f32[91,364], index: 3, kind: input, shape index: {}]   ;;  %s3964_s4 = inlined_call_operand.vmem [shape: f32[4,364], index: 4, kind: input, shape index: {}]   ;;  %s3965_s5 = inlined_call_operand.vmem [shape: f32[14,364], index: 5, kind: output, shape index: {}]  }
   0x1   :  { %s22_s19 = sshll.u32 %s2971_s18, 4  ;;  %s23_s19 = int_to_ptr.vmem [resolvable:$true] %s22_s19 }
   0x2   :  { %s2957_s20 = scalar_lea.vmem %s23_s19, 4608  ;;  %p2962_p1 = scmp.lt.s32.totalorder %s23_s19, %s23_s19 }
   0x3   :  { %p2958_p0 = scmp.ne.s32.totalorder %s23_s19, %s2957_s20  ;;  %p2963_p2 = scmp.lt.s32.totalorder %s2957_s20, %s2957_s20 }
   0x5   :  { %p2964_p3 = por %p2963_p2, %p2962_p1 }
   0x7   :  { %p2965_p4 = pnand %p2964_p3, %p2958_p0 }
   0x9   :  { %2968 = shalt.err (!%p2965_p4)
}
   0xa   :  { %s2972_s21 = smov 384   ;;  %s2973_s22 = smov 24  }
   0xb   :  { %28 = dma.hbm_to_vmem [thread:$0]  %s3963_s3, 4608, %s23_s19, [#allocation3], %s2972_s21, %s2972_s21, %s2973_s22  }
   0xc   :  { %2969 = dma.done.wait [#allocation3], 4608  }
   0xd   :  { %2970 = vsyncadd [#allocation3], 4294962688  ;;  %v3985_v0 = vmov 0.0   ;;  %vm79_vm0 = vcmask 1042432   ;;  %v70_v1 = vld [vmem:[#allocation2 + $0x110] sm:$0x7] }
   0xe   :  { %177 = vmatprep.mubr.f32.mxu0 %v3985_v0  ;;  %384 = vmatprep.mubr.f32.mxu1 %v3985_v0  ;;  %v69_v2 = vld [vmem:[#allocation2 + $0x108] sm:$0x7]  ;;  %v84_v3 = vsel %vm79_vm0, %v70_v1, 0  ;;  %v67_v5 = vld [vmem:[#allocation2 + $0xf8] sm:$0xff]  ;;  %v66_v6 = vld [vmem:[#allocation2 + $0xf0] sm:$0xff]  ;;  %vm72_vm1 = vcmask 744448  }
   0xf   :  { %v81_v4 = vsel %vm79_vm0, %v69_v2, 0  ;;  %v64_v7 = vld [vmem:[#allocation2 + $0xe0] sm:$0xff]  ;;  %v3013_v8 = vand.u32 4294901760, %v84_v3  ;;  %v3017_v10 = vand.u32 4294901760, %v67_v5  ;;  %v63_v11 = vld [vmem:[#allocation2 + $0xd8] sm:$0xff]  ;;  %v61_v12 = vld [vmem:[#allocation2 + $0xc8] sm:$0xff] }
  0x10   :  { %v3015_v9 = vand.u32 4294901760, %v81_v4  ;;  %v3019_v13 = vand.u32 4294901760, %v66_v6  ;;  %v3021_v14 = vand.u32 4294901760, %v64_v7  ;;  %v3023_v15 = vand.u32 4294901760, %v63_v11  ;;  %v60_v17 = vld [vmem:[#allocation2 + $0xc0] sm:$0xff]  ;;  %v58_v18 = vld [vmem:[#allocation2 + $0xb0] sm:$0xff] }
  0x11   :  { %v3025_v16 = vand.u32 4294901760, %v61_v12  ;;  %98 = vmatprep.subr.mxu0 %v3013_v8  ;;  %v3028_v19 = vand.u32 4294901760, %v60_v17  ;;  %v3030_v20 = vand.u32 4294901760, %v58_v18  ;;  %v3033_v21 = vsub.f32 %v84_v3, %v3013_v8  ;;  %v3035_v22 = vld [vmem:[#allocation2 + $0xa8] sm:$0xff]  ;;  %v3040_v24 = vld [vmem:[#allocation2 + $0x98] sm:$0xff]  ;;  %v3042_v25 = vld [vmem:[#allocation2 + $0x90] sm:$0xff] }
  0x12   :  { %v3038_v23 = vsub.f32 %v81_v4, %v3015_v9  ;;  %100 = vmatpush1.msra.mxu0 %v3015_v9  ;;  %v3046_v26 = vand.u32 4294901760, %v3035_v22  ;;  %v3049_v27 = vand.u32 4294901760, %v3040_v24  ;;  %v3052_v28 = vsub.f32 %v67_v5, %v3017_v10  ;;  %v3057_v30 = vld [vmem:[#allocation2 + $0x80] sm:$0xff]  ;;  %v3059_v31 = vld [vmem:[#allocation2 + $0x78] sm:$0xff]  ;;  %v3061_v32 = vld [vmem:[#allocation2 + $0x68] sm:$0xff] }
  0x13   :  { %v3055_v29 = vand.u32 4294901760, %v3042_v25  ;;  %102 = vmatprep.subr.mxu0 %v3017_v10  ;;  %v3983_v33 = vand.u32 4294901760, %v3033_v21  ;;  %v3067_v35 = vsub.f32 %v66_v6, %v3019_v13  ;;  %v3070_v36 = vand.u32 4294901760, %v3057_v30  ;;  %v3083_v41 = vld [vmem:[#allocation2 + $0x60] sm:$0xff]  ;;  %v3105_v50 = vld [vmem:[#allocation2 + $0x50] sm:$0xff]  ;;  %v3114_v55 = vld [vmem:[#allocation2 + $0x48] sm:$0xff] }
  0x14   :  { %v3981_v34 = vand.u32 4294901760, %v3038_v23  ;;  %104 = vmatpush1.msra.mxu0 %v3019_v13  ;;  %v3976_v37 = vand.u32 4294901760, %v3052_v28  ;;  %v3075_v38 = vsub.f32 %v64_v7, %v3021_v14  ;;  %v3078_v39 = vand.u32 4294901760, %v3059_v31  ;;  %v3124_v60 = vld [vmem:[#allocation2 + $0x38] sm:$0xff]  ;;  %v3136_v2 = vld [vmem:[#allocation2 + $0x30] sm:$0xff]  ;;  %v3145_v7 = vld [vmem:[#allocation2 + $0x20] sm:$0xff] }
  0x15   :  { %v3081_v40 = vsub.f32 %v63_v11, %v3023_v15  ;;  %106 = vmatprep.subr.mxu0 %v3021_v14  ;;  %v211_v42 = vsub.f32 %v3033_v21, %v3983_v33  ;;  %v3974_v44 = vand.u32 4294901760, %v3067_v35  ;;  %v3094_v45 = vand.u32 4294901760, %v3061_v32 }
  0x16   :  { %v217_v43 = vsub.f32 %v3038_v23, %v3981_v34  ;;  %108 = vmatpush1.msra.mxu0 %v3023_v15  ;;  %v223_v46 = vsub.f32 %v3052_v28, %v3976_v37  ;;  %v3973_v47 = vand.u32 4294901760, %v3075_v38  ;;  %v3103_v49 = vsub.f32 %v61_v12, %v3025_v16 }
  0x17   :  { %v3970_v48 = vand.u32 4294901760, %v3081_v40  ;;  %110 = vmatprep.subr.mxu0 %v3025_v16  ;;  %v212_v51 = vand.u32 4294901760, %v211_v42  ;;  %v229_v53 = vsub.f32 %v3067_v35, %v3974_v44  ;;  %v3112_v54 = vand.u32 4294901760, %v3083_v41  ;;  %v3157_v42 = vld [vmem:[#allocation2 + $0x18] sm:$0xff] }
  0x18   :  { %v218_v52 = vand.u32 4294901760, %v217_v43  ;;  %112 = vmatpush1.msra.mxu0 %v3028_v19  ;;  %v224_v56 = vand.u32 4294901760, %v223_v46  ;;  %v235_v57 = vsub.f32 %v3075_v38, %v3973_v47  ;;  %v3968_v59 = vand.u32 4294901760, %v3103_v49 }
  0x19   :  { %v241_v58 = vsub.f32 %v3081_v40, %v3970_v48  ;;  %114 = vmatprep.subr.mxu0 %v3030_v20  ;;  %213 = vmatprep.subr.mxu1 %v212_v51  ;;  %v230_v61 = vand.u32 4294901760, %v229_v53  ;;  %v3128_v62 = vsub.f32 %v60_v17, %v3028_v19  ;;  %v3131_v63 = vand.u32 4294901760, %v3105_v50 }
  0x1a   :  { %v3134_v1 = vsub.f32 %v58_v18, %v3030_v20  ;;  %116 = vmatpush1.msra.mxu0 %v3046_v26  ;;  %219 = vmatpush1.msra.mxu1 %v218_v52  ;;  %v236_v3 = vand.u32 4294901760, %v235_v57  ;;  %v247_v5 = vsub.f32 %v3103_v49, %v3968_v59  ;;  %v3143_v6 = vand.u32 4294901760, %v3114_v55  ;;  %v3182_v57 = vld [vmem:[#allocation2 + $0x8] sm:$0xff] }
  0x1b   :  { %v242_v4 = vand.u32 4294901760, %v241_v58  ;;  %118 = vmatprep.subr.mxu0 %v3049_v27  ;;  %225 = vmatprep.subr.mxu1 %v224_v56  ;;  %v3967_v11 = vand.u32 4294901760, %v3128_v62  ;;  %v3152_v17 = vsub.f32 %v3035_v22, %v3046_v26  ;;  %v3155_v18 = vand.u32 4294901760, %v3124_v60 }
  0x1c   :  { %v3966_v12 = vand.u32 4294901760, %v3134_v1  ;;  %120 = vmatpush1.msra.mxu0 %v3055_v29  ;;  %231 = vmatpush1.msra.mxu1 %v230_v61  ;;  %v248_v43 = vand.u32 4294901760, %v247_v5  ;;  %v3162_v46 = vsub.f32 %v3040_v24, %v3049_v27  ;;  %v3165_v51 = vand.u32 4294901760, %v3136_v2  ;;  %v3194_v5 = vld [vmem:[#allocation2] sm:$0xff] }
  0x1d   :  { %v3169_v22 = vsub.f32 %v3042_v25, %v3055_v29  ;;  %122 = vmatprep.subr.mxu0 %v3070_v36  ;;  %237 = vmatprep.subr.mxu1 %v236_v3  ;;  %v253_v52 = vsub.f32 %v3128_v62, %v3967_v11  ;;  %v3969_v24 = vand.u32 4294901760, %v3152_v17  ;;  %v3180_v56 = vand.u32 4294901760, %v3145_v7 }
  0x1e   :  { %v259_v53 = vsub.f32 %v3134_v1, %v3966_v12  ;;  %124 = vmatpush1.msra.mxu0 %v3078_v39  ;;  %243 = vmatpush1.msra.mxu1 %v242_v4  ;;  %v3971_v25 = vand.u32 4294901760, %v3162_v46  ;;  %v3189_v61 = vsub.f32 %v3057_v30, %v3070_v36  ;;  %v3192_v3 = vand.u32 4294901760, %v3157_v42 }
  0x1f   :  { %v3972_v58 = vand.u32 4294901760, %v3169_v22  ;;  %126 = vmatprep.subr.mxu0 %v3094_v45  ;;  %249 = vmatprep.subr.mxu1 %v248_v43  ;;  %v254_v12 = vand.u32 4294901760, %v253_v52  ;;  %v265_v4 = vsub.f32 %v3152_v17, %v3969_v24  ;;  %v3202_v59 = vsub.f32 %v3059_v31, %v3078_v39  ;;  %v34_v31 = vld [vmem:[%s3960_s0] sm:$0xff] }
  0x20   :  { %3993 = vst [vmem:[#allocation5_spill] sm:$0xff] %v3192_v3  ;;  %v260_v11 = vand.u32 4294901760, %v259_v53  ;;  %128 = vmatpush1.msra.mxu0 %v3112_v54  ;;  %v271_v30 = vsub.f32 %v3162_v46, %v3971_v25  ;;  %v3975_v52 = vand.u32 4294901760, %v3189_v61  ;;  %v3213_v53 = vand.u32 4294901760, %v3182_v57 }
  0x21   :  { %v277_v43 = vsub.f32 %v3169_v22, %v3972_v58  ;;  %255 = vmatpush1.msra.mxu1 %v254_v12  ;;  %130 = vmatprep.subr.mxu0 %v3131_v63  ;;  %v266_v24 = vand.u32 4294901760, %v265_v4  ;;  %v3977_v48 = vand.u32 4294901760, %v3202_v59  ;;  %v3222_v25 = vsub.f32 %v3061_v32, %v3094_v45 }
  0x22   :  { %v3225_v58 = vand.u32 4294901760, %v3194_v5  ;;  %261 = vmatprep.subr.mxu1 %v260_v11  ;;  %132 = vmatpush1.msra.mxu0 %v3143_v6  ;;  %v272_v47 = vand.u32 4294901760, %v271_v30  ;;  %v283_v12 = vsub.f32 %v3189_v61, %v3975_v52  ;;  %v3233_v4 = vsub.f32 %v3083_v41, %v3112_v54 }
  0x23   :  { %v278_v44 = vand.u32 4294901760, %v277_v43  ;;  %267 = vmatpush1.msra.mxu1 %v266_v24  ;;  %134 = vmatprep.subr.mxu0 %v3155_v18  ;;  %v289_v32 = vsub.f32 %v3202_v59, %v3977_v48  ;;  %v3978_v11 = vand.u32 4294901760, %v3222_v25  ;;  %v3242_v30 = vsub.f32 %v3105_v50, %v3131_v63 }
  0x24   :  { %v74_v43 = vsel %vm72_vm1, %v34_v31, 0  ;;  %273 = vmatprep.subr.mxu1 %v272_v47  ;;  %136 = vmatpush1.msra.mxu0 %v3165_v51  ;;  %v284_v41 = vand.u32 4294901760, %v283_v12  ;;  %v3979_v24 = vand.u32 4294901760, %v3233_v4  ;;  %v3251_v37 = vsub.f32 %v3114_v55, %v3143_v6 }
  0x25   :  { %v3247_v52 = vand.u32 4294901760, %v74_v43  ;;  %279 = vmatpush1.msra.mxu1 %v278_v44  ;;  %138 = vmatprep.subr.mxu0 %v3180_v56  ;;  %v290_v48 = vand.u32 4294901760, %v289_v32  ;;  %v295_v50 = vsub.f32 %v3222_v25, %v3978_v11  ;;  %v3980_v47 = vand.u32 4294901760, %v3242_v30 }
  0x26   :  { %v3260_v31 = vsub.f32 %v3124_v60, %v3155_v18  ;;  %285 = vmatprep.subr.mxu1 %v284_v41  ;;  %140 = vmatpush1.msra.mxu0 %v3192_v3  ;;  %v301_v44 = vsub.f32 %v3233_v4, %v3979_v24  ;;  %v3982_v12 = vand.u32 4294901760, %v3251_v37  ;;  %v3272_v32 = vsub.f32 %v3136_v2, %v3165_v51 }
  0x27   :  { %v3267_v55 = vsub.f32 %v74_v43, %v3247_v52  ;;  %291 = vmatpush1.msra.mxu1 %v290_v48  ;;  %142 = vmatprep.subr.mxu0 %v3213_v53  ;;  %v296_v60 = vand.u32 4294901760, %v295_v50  ;;  %v307_v41 = vsub.f32 %v3242_v30, %v3980_v47  ;;  %v3281_v43 = vsub.f32 %v3145_v7, %v3180_v56 }
  0x28   :  { %v3984_v11 = vand.u32 4294901760, %v3260_v31  ;;  %144 = vmatpush1.msra.mxu0 %v3225_v58  ;;  %v302_v24 = vand.u32 4294901760, %v301_v44  ;;  %v313_v48 = vsub.f32 %v3251_v37, %v3982_v12  ;;  %v3989_v50 = vand.u32 4294901760, %v3272_v32  ;;  %v35_v12 = vld [vmem:[%s3960_s0 + $0x8] sm:$0x3f] }
  0x29   :  { %v3285_v2 = vand.u32 4294901760, %v3267_v55  ;;  %297 = vmatprep.subr.mxu1 %v296_v60  ;;  %v308_v47 = vand.u32 4294901760, %v307_v41  ;;  %409 = vmatprep.subr.mxu0 %v3033_v21  ;;  %v3992_v34 = vand.u32 4294901760, %v3281_v43  ;;  %v3298_v44 = vsub.f32 %v3157_v42, %v3192_v3 }
  0x2a   :  { %v319_v7 = vsub.f32 %v3260_v31, %v3984_v11  ;;  %303 = vmatpush1.msra.mxu1 %v302_v24  ;;  %v314_v41 = vand.u32 4294901760, %v313_v48  ;;  %v325_v33 = vsub.f32 %v3272_v32, %v3989_v50  ;;  %v3310_v11 = vsub.f32 %v3182_v57, %v3213_v53 }
  0x2b   :  { %3994 = vst [vmem:[#allocation6_spill] sm:$0xff] %v3285_v2  ;;  %v181_v60 = vsub.f32 %v3267_v55, %v3285_v2  ;;  %309 = vmatprep.subr.mxu1 %v308_v47  ;;  %v331_v0 = vsub.f32 %v3281_v43, %v3992_v34  ;;  %v336_v24 = vand.u32 4294901760, %v3298_v44  ;;  %v3318_v2 = vsub.f32 %v3194_v5, %v3225_v58 }
  0x2c   :  { %v320_v42 = vand.u32 4294901760, %v319_v7  ;;  %315 = vmatpush1.msra.mxu1 %v314_v41  ;;  %v326_v50 = vand.u32 4294901760, %v325_v33  ;;  %v342_v3 = vand.u32 4294901760, %v3310_v11  ;;  %v77_v57 = vsel %vm72_vm1, %v35_v12, 0 }
  0x2d   :  { %v3320_v48 = vand.u32 4294901760, %v181_v60  ;;  %v332_v47 = vand.u32 4294901760, %v331_v0  ;;  %v337_v7 = vsub.f32 %v3298_v44, %v336_v24  ;;  %v348_v34 = vand.u32 4294901760, %v3318_v2 }
  0x2e   :  { %321 = vmatprep.subr.mxu1 %v320_v42  ;;  %v343_v5 = vsub.f32 %v3310_v11, %v342_v3  ;;  %v3332_v33 = vand.u32 4294901760, %v77_v57  ;;  %v3995_v41 = vmov 0.0   ;;  %vm1528_vm2 = vcmask 31744  }
  0x2f   :  { %183 = vmatmul.mubr.f32.vlgmr.msra.gmra.mxu0 %v3320_v48  ;;  %327 = vmatpush1.msra.mxu1 %v326_v50  ;;  %v338_v12 = vand.u32 4294901760, %v337_v7  ;;  %v349_v0 = vsub.f32 %v3318_v2, %v348_v34  ;;  %vm1535_vm3 = vcmask 1043456   ;;  %vm2629_vm4 = vcmask 881664  }
  0x30   :  { %412 = vmatpush1.msra.mxu0 %v3038_v23  ;;  %333 = vmatprep.subr.mxu1 %v332_v47  ;;  %v344_v60 = vand.u32 4294901760, %v343_v5  ;;  %v3343_v42 = vsub.f32 %v77_v57, %v3332_v33  ;;  %v3996_v5 = vand.u32 4294901760, %v3033_v21  ;;  %v4000_v21 = vand.u32 4294901760, %v3075_v38 }
  0x31   :  { %415 = vmatprep.subr.mxu0 %v3052_v28  ;;  %188 = vmatprep.mubr.f32.mxu0 %v3995_v41  ;;  %v350_v50 = vand.u32 4294901760, %v349_v0  ;;  %v3998_v0 = vand.u32 4294901760, %v3052_v28  ;;  %v4003_v28 = vand.u32 4294901760, %v3103_v49  ;;  %vm2625_vm5 = vcmask 883712  }
  0x32   :  { %418 = vmatpush1.msra.mxu0 %v3067_v35  ;;  %339 = vmatpush1.msra.mxu1 %v338_v12  ;;  %v3353_v47 = vand.u32 4294901760, %v3343_v42  ;;  %v3997_v12 = vand.u32 4294901760, %v3038_v23  ;;  %v4001_v23 = vld [vmem:[#allocation5_spill] sm:$0xff] }
  0x33   :  { %421 = vmatprep.subr.mxu0 %v3075_v38  ;;  %345 = vmatprep.subr.mxu1 %v344_v60  ;;  %v3999_v60 = vand.u32 4294901760, %v3067_v35  ;;  %v4004_v35 = vand.u32 4294901760, %v3128_v62  ;;  %v4006_v38 = vand.u32 4294901760, %v3134_v1 }
  0x34   :  { %424 = vmatpush1.msra.mxu0 %v3081_v40  ;;  %351 = vmatpush1.msra.mxu1 %v350_v50  ;;  %v192_v57 = vsub.f32 %v3343_v42, %v3353_v47  ;;  %v4002_v50 = vand.u32 4294901760, %v3081_v40  ;;  %v4007_v40 = vand.u32 4294901760, %v3152_v17 }
  0x35   :  { %427 = vmatprep.subr.mxu0 %v3103_v49  ;;  %386 = vmatmul.mubr.f32.vlgmr.msra.gmra.mxu1 %v3247_v52  ;;  %v71_v49 = vld [vmem:[#allocation2 + $0x118] sm:$0x7] }
  0x36   :  { %430 = vmatpush1.msra.mxu0 %v3128_v62  ;;  %537 = vmatprep.subr.mxu1 %v3013_v8  ;;  %v3373_v7 = vand.u32 4294901760, %v192_v57  ;;  %v4005_v57 = vld [vmem:[#allocation6_spill] sm:$0xff]  ;;  %v4009_v62 = vand.u32 4294901760, %v3169_v22 }
  0x37   :  { %433 = vmatprep.subr.mxu0 %v3134_v1  ;;  %539 = vmatpush1.msra.mxu1 %v3015_v9  ;;  %v87_v1 = vsel %vm79_vm0, %v71_v49, 0 }
  0x38   :  { %436 = vmatpush1.msra.mxu0 %v3152_v17  ;;  %541 = vmatprep.subr.mxu1 %v3017_v10  ;;  %v3445_v17 = vand.u32 4294901760, %v87_v1 }
  0x39   :  { %439 = vmatprep.subr.mxu0 %v3162_v46  ;;  %543 = vmatpush1.msra.mxu1 %v3019_v13 }
  0x3a   :  { %442 = vmatpush1.msra.mxu0 %v3169_v22  ;;  %545 = vmatprep.subr.mxu1 %v3021_v14  ;;  %v4016_v22 = vand.u32 4294901760, %v3260_v31 }
  0x3b   :  { %445 = vmatprep.subr.mxu0 %v3189_v61  ;;  %547 = vmatpush1.msra.mxu1 %v3023_v15 }
  0x3c   :  { %448 = vmatpush1.msra.mxu0 %v3202_v59  ;;  %549 = vmatprep.subr.mxu1 %v3025_v16 }
  0x3d   :  { %451 = vmatprep.subr.mxu0 %v3222_v25  ;;  %551 = vmatpush1.msra.mxu1 %v3028_v19 }
  0x3e   :  { %454 = vmatpush1.msra.mxu0 %v3233_v4  ;;  %553 = vmatprep.subr.mxu1 %v3030_v20 }
  0x3f   :  { %457 = vmatprep.subr.mxu0 %v3242_v30  ;;  %555 = vmatpush1.msra.mxu1 %v3046_v26 }
  0x40   :  { %460 = vmatpush1.msra.mxu0 %v3251_v37  ;;  %557 = vmatprep.subr.mxu1 %v3049_v27 }
  0x41   :  { %463 = vmatprep.subr.mxu0 %v3260_v31  ;;  %559 = vmatpush1.msra.mxu1 %v3055_v29 }
  0x42   :  { %466 = vmatpush1.msra.mxu0 %v3272_v32  ;;  %561 = vmatprep.subr.mxu1 %v3070_v36 }
  0x43   :  { %194 = vmatmul.mubr.f32.gmra.mxu0 %v3373_v7  ;;  %469 = vmatprep.subr.mxu0 %v3281_v43 }
  0x44   :  { %472 = vmatpush1.msra.mxu0 %v3298_v44  ;;  %563 = vmatpush1.msra.mxu1 %v3078_v39 }
  0x45   :  { %475 = vmatprep.subr.mxu0 %v3310_v11  ;;  %565 = vmatprep.subr.mxu1 %v3094_v45 }
  0x46   :  { %478 = vmatpush1.msra.mxu0 %v3318_v2  ;;  %511 = vmatprep.mubr.f32.mxu0 %v3995_v41 }
  0x47   :  { %567 = vmatpush1.msra.mxu1 %v3112_v54  ;;  %391 = vmatprep.mubr.f32.mxu1 %v3995_v41 }
  0x48   :  { %514 = vmatmul.mubr.f32.vlgmr.msra.gmra.mxu0 %v3267_v55  ;;  %569 = vmatprep.subr.mxu1 %v3131_v63 }
  0x49   :  { %646 = vmatprep.subr.mxu0 %v3996_v5  ;;  %393 = vmatmul.mubr.f32.gmra.mxu1 %v3332_v33  ;;  %v4008_v5 = vand.u32 4294901760, %v3162_v46  ;;  %v4013_v46 = vand.u32 4294901760, %v3233_v4 }
  0x4a   :  { %571 = vmatpush1.msra.mxu1 %v3143_v6  ;;  %650 = vmatpush1.msra.mxu0 %v3997_v12 }
  0x4b   :  { %573 = vmatprep.subr.mxu1 %v3155_v18  ;;  %654 = vmatprep.subr.mxu0 %v3998_v0 }
  0x4c   :  { %519 = vmatprep.mubr.f32.mxu0 %v3995_v41  ;;  %575 = vmatpush1.msra.mxu1 %v3165_v51 }
  0x4d   :  { %658 = vmatpush1.msra.mxu0 %v3999_v60  ;;  %577 = vmatprep.subr.mxu1 %v3180_v56  ;;  %v44_v60 = vld [vmem:[#allocation2 + $0x40] sm:$0xff] }
  0x4e   :  { %522 = vmatmul.mubr.f32.gmra.mxu0 %v3343_v42  ;;  %662 = vmatprep.subr.mxu0 %v4000_v21 }
  0x4f   :  { %579 = vmatpush1.msra.mxu1 %v4001_v23  ;;  %666 = vmatpush1.msra.mxu0 %v4002_v50 }
  0x50   :  { %581 = vmatprep.subr.mxu1 %v3213_v53  ;;  %670 = vmatprep.subr.mxu0 %v4003_v28  ;;  %v41_v28 = vld [vmem:[#allocation2 + $0x28] sm:$0xff] }
  0x51   :  { %583 = vmatpush1.msra.mxu1 %v3225_v58  ;;  %616 = vmatprep.mubr.f32.mxu1 %v3995_v41 }
  0x52   :  { %674 = vmatpush1.msra.mxu0 %v4004_v35  ;;  %620 = vmatmul.mubr.f32.vlgmr.msra.gmra.mxu1 %v4005_v57 }
  0x53   :  { %678 = vmatprep.subr.mxu0 %v4006_v38  ;;  %795 = vmatprep.subr.mxu1 %v3013_v8  ;;  %v4010_v8 = vand.u32 4294901760, %v3189_v61 }
  0x54   :  { %682 = vmatpush1.msra.mxu0 %v4007_v40  ;;  %797 = vmatpush1.msra.mxu1 %v3015_v9  ;;  %v4011_v9 = vand.u32 4294901760, %v3202_v59 }
  0x55   :  { %686 = vmatprep.subr.mxu0 %v4008_v5  ;;  %799 = vmatprep.subr.mxu1 %v3017_v10  ;;  %v4012_v10 = vand.u32 4294901760, %v3222_v25  ;;  %v62_v25 = vld [vmem:[#allocation2 + $0xd0] sm:$0xff] }
  0x56   :  { %625 = vmatprep.mubr.f32.mxu1 %v3995_v41  ;;  %690 = vmatpush1.msra.mxu0 %v4009_v62  ;;  %v38_v5 = vld [vmem:[#allocation2 + $0x10] sm:$0xff] }
  0x57   :  { %801 = vmatpush1.msra.mxu1 %v3019_v13  ;;  %694 = vmatprep.subr.mxu0 %v4010_v8  ;;  %v68_v13 = vld [vmem:[#allocation2 + $0x100] sm:$0xff]  ;;  %v3575_v8 = vand.u32 4294901760, %v41_v28 }
  0x58   :  { %629 = vmatmul.mubr.f32.gmra.mxu1 %v3353_v47  ;;  %803 = vmatprep.subr.mxu1 %v3021_v14  ;;  %v4014_v14 = vand.u32 4294901760, %v3242_v30  ;;  %v3456_v59 = vand.u32 4294901760, %v68_v13  ;;  %v50_v30 = vld [vmem:[#allocation2 + $0x70] sm:$0xff] }
  0x59   :  { %698 = vmatpush1.msra.mxu0 %v4011_v9  ;;  %805 = vmatpush1.msra.mxu1 %v3023_v15  ;;  %v4015_v15 = vand.u32 4294901760, %v3251_v37  ;;  %v4018_v37 = vand.u32 4294901760, %v3281_v43  ;;  %v47_v43 = vld [vmem:[#allocation2 + $0x58] sm:$0xff] }
  0x5a   :  { %702 = vmatprep.subr.mxu0 %v4012_v10  ;;  %807 = vmatprep.subr.mxu1 %v3025_v16  ;;  %v65_v16 = vld [vmem:[#allocation2 + $0xe8] sm:$0xff]  ;;  %v3476_v61 = vsub.f32 %v68_v13, %v3456_v59  ;;  %v3542_v12 = vand.u32 4294901760, %v47_v43  ;;  %v3585_v13 = vand.u32 4294901760, %v38_v5 }
  0x5b   :  { %706 = vmatpush1.msra.mxu0 %v4013_v46  ;;  %809 = vmatpush1.msra.mxu1 %v3028_v19  ;;  %v4017_v19 = vand.u32 4294901760, %v3272_v32 }
  0x5c   :  { %710 = vmatprep.subr.mxu0 %v4014_v14  ;;  %811 = vmatprep.subr.mxu1 %v3030_v20  ;;  %v3465_v20 = vsub.f32 %v87_v1, %v3445_v17  ;;  %v3572_v62 = vsub.f32 %v47_v43, %v3542_v12 }
  0x5d   :  { %714 = vmatpush1.msra.mxu0 %v4015_v15  ;;  %813 = vmatpush1.msra.mxu1 %v3046_v26  ;;  %v3470_v26 = vand.u32 4294901760, %v65_v16 }
  0x5e   :  { %718 = vmatprep.subr.mxu0 %v4016_v22  ;;  %815 = vmatprep.subr.mxu1 %v3049_v27  ;;  %v59_v27 = vld [vmem:[#allocation2 + $0xb8] sm:$0xff]  ;;  %v3598_v22 = vsub.f32 %v41_v28, %v3575_v8 }
  0x5f   :  { %722 = vmatpush1.msra.mxu0 %v4017_v19  ;;  %817 = vmatpush1.msra.mxu1 %v3055_v29  ;;  %v3481_v29 = vand.u32 4294901760, %v62_v25  ;;  %v3491_v4 = vand.u32 4294901760, %v59_v27 }
  0x60   :  { %726 = vmatprep.subr.mxu0 %v4018_v37  ;;  %819 = vmatprep.subr.mxu1 %v3070_v36  ;;  %v3487_v36 = vand.u32 4294901760, %v3465_v20 }
  0x61   :  { %730 = vmatpush1.msra.mxu0 %v336_v24  ;;  %821 = vmatpush1.msra.mxu1 %v3078_v39  ;;  %v56_v39 = vld [vmem:[#allocation2 + $0xa0] sm:$0xff]  ;;  %v3506_v11 = vsub.f32 %v62_v25, %v3481_v29  ;;  %v3520_v32 = vsub.f32 %v59_v27, %v3491_v4  ;;  %v3608_v27 = vsub.f32 %v38_v5, %v3585_v13  ;;  %v2975_v5 = vmov 0  }
  0x62   :  { %734 = vmatprep.subr.mxu0 %v342_v3  ;;  %823 = vmatprep.subr.mxu1 %v3094_v45  ;;  %v3494_v3 = vsub.f32 %v65_v16, %v3470_v26  ;;  %v53_v45 = vld [vmem:[#allocation2 + $0x88] sm:$0xff]  ;;  %v3594_v16 = vand.u32 4294901760, %v3572_v62 }
  0x63   :  { %738 = vmatpush1.msra.mxu0 %v348_v34  ;;  %771 = vmatprep.mubr.f32.mxu0 %v3995_v41  ;;  %v3499_v34 = vand.u32 4294901760, %v3476_v61  ;;  %v3531_v2 = vand.u32 4294901760, %v3506_v11  ;;  %v3545_v0 = vand.u32 4294901760, %v3520_v32  ;;  %v3622_v43 = vand.u32 4294901760, %v3608_v27 }
  0x64   :  { %825 = vmatpush1.msra.mxu1 %v3112_v54  ;;  %773 = vmatmul.mubr.f32.vlgmr.msra.gmra.mxu0 %v3247_v52  ;;  %v3503_v54 = vand.u32 4294901760, %v56_v39  ;;  %v3517_v31 = vand.u32 4294901760, %v3494_v3 }
  0x65   :  { %827 = vmatprep.subr.mxu1 %v3131_v63  ;;  %2738 = vmatprep.subr.mxu0 %v3445_v17  ;;  %v998_v63 = vsub.f32 %v3465_v20, %v3487_v36  ;;  %v1026_v40 = vsub.f32 %v3520_v32, %v3545_v0 }
  0x66   :  { %829 = vmatpush1.msra.mxu1 %v3143_v6  ;;  %2739 = vmatpush3.msra.mxu0 %v3445_v17  ;;  %v3514_v6 = vand.u32 4294901760, %v53_v45  ;;  %v3534_v44 = vsub.f32 %v56_v39, %v3503_v54  ;;  %v1012_v24 = vsub.f32 %v3494_v3, %v3517_v31 }
  0x67   :  { %831 = vmatprep.subr.mxu1 %v3155_v18  ;;  %2740 = vmatprep.subr.mxu0 %v3456_v59  ;;  %v1005_v18 = vsub.f32 %v3476_v61, %v3499_v34  ;;  %v1027_v14 = vand.u32 4294901760, %v1026_v40 }
  0x68   :  { %778 = vmatprep.mubr.f32.mxu0 %v3995_v41  ;;  %833 = vmatpush1.msra.mxu1 %v3165_v51  ;;  %v3528_v51 = vand.u32 4294901760, %v50_v30  ;;  %v3548_v21 = vsub.f32 %v53_v45, %v3514_v6  ;;  %v3557_v50 = vand.u32 4294901760, %v3534_v44  ;;  %v1013_v38 = vand.u32 4294901760, %v1012_v24 }
  0x69   :  { %2741 = vmatpush3.msra.mxu0 %v3456_v59  ;;  %835 = vmatprep.subr.mxu1 %v3180_v56  ;;  %v999_v56 = vand.u32 4294901760, %v998_v63  ;;  %v1054_v45 = vsub.f32 %v3572_v62, %v3594_v16  ;;  %v3615_v63 = vand.u32 4294901760, %v3598_v22 }
  0x6a   :  { %780 = vmatmul.mubr.f32.gmra.mxu0 %v3332_v33  ;;  %2742 = vmatprep.subr.mxu0 %v3470_v26  ;;  %v3560_v35 = vsub.f32 %v50_v30, %v3528_v51  ;;  %v3569_v49 = vand.u32 4294901760, %v3548_v21  ;;  %v1033_v9 = vsub.f32 %v3534_v44, %v3557_v50 }
  0x6b   :  { %837 = vmatpush1.msra.mxu1 %v4001_v23  ;;  %2743 = vmatpush3.msra.mxu0 %v3470_v26  ;;  %v1006_v23 = vand.u32 4294901760, %v1005_v18  ;;  %v1068_v24 = vsub.f32 %v3598_v22, %v3615_v63 }
  0x6c   :  { %839 = vmatprep.subr.mxu1 %v3213_v53  ;;  %2744 = vmatprep.subr.mxu0 %v3481_v29  ;;  %v1019_v53 = vsub.f32 %v3506_v11, %v3531_v2  ;;  %v3582_v10 = vand.u32 4294901760, %v3560_v35  ;;  %v1040_v15 = vsub.f32 %v3548_v21, %v3569_v49  ;;  %v1034_v19 = vand.u32 4294901760, %v1033_v9 }
  0x6d   :  { %841 = vmatpush1.msra.mxu1 %v3225_v58  ;;  %874 = vmatprep.mubr.f32.mxu1 %v3995_v41  ;;  %v3563_v58 = vand.u32 4294901760, %v44_v60 }
  0x6e   :  { %2745 = vmatpush3.msra.mxu0 %v3481_v29  ;;  %876 = vmatmul.mubr.f32.vlgmr.msra.gmra.mxu1 %v3247_v52  ;;  %v1020_v1 = vand.u32 4294901760, %v1019_v53  ;;  %v1047_v25 = vsub.f32 %v3560_v35, %v3582_v10  ;;  %v1041_v39 = vand.u32 4294901760, %v1040_v15  ;;  %v1069_v53 = vand.u32 4294901760, %v1068_v24 }
  0x6f   :  { %2746 = vmatprep.subr.mxu0 %v3491_v4  ;;  %2765 = vmatprep.subr.mxu1 %v999_v56  ;;  %v3588_v46 = vsub.f32 %v44_v60, %v3563_v58 }
  0x70   :  { %2747 = vmatpush3.msra.mxu0 %v3491_v4  ;;  %2766 = vmatpush3.msra.mxu1 %v999_v56  ;;  %v1048_v30 = vand.u32 4294901760, %v1047_v25  ;;  %v1055_v56 = vand.u32 4294901760, %v1054_v45 }
  0x71   :  { %2748 = vmatprep.subr.mxu0 %v3503_v54  ;;  %2767 = vmatprep.subr.mxu1 %v1006_v23  ;;  %v3605_v37 = vand.u32 4294901760, %v3588_v46 }
  0x72   :  { %881 = vmatprep.mubr.f32.mxu1 %v3995_v41  ;;  %2749 = vmatpush3.msra.mxu0 %v3503_v54 }
  0x73   :  { %2768 = vmatpush3.msra.mxu1 %v1006_v23  ;;  %2750 = vmatprep.subr.mxu0 %v3514_v6  ;;  %v1061_v18 = vsub.f32 %v3588_v46, %v3605_v37  ;;  %v1075_v23 = vsub.f32 %v3608_v27, %v3622_v43 }
  0x74   :  { %883 = vmatmul.mubr.f32.gmra.mxu1 %v3332_v33  ;;  %2769 = vmatprep.subr.mxu1 %v1013_v38 }
  0x75   :  { %2751 = vmatpush3.msra.mxu0 %v3514_v6  ;;  %2770 = vmatpush3.msra.mxu1 %v1013_v38  ;;  %v1062_v60 = vand.u32 4294901760, %v1061_v18  ;;  %v1076_v28 = vand.u32 4294901760, %v1075_v23 }
  0x76   :  { %2752 = vmatprep.subr.mxu0 %v3528_v51  ;;  %2771 = vmatprep.subr.mxu1 %v1020_v1 }
  0x77   :  { %2753 = vmatpush3.msra.mxu0 %v3528_v51  ;;  %2772 = vmatpush3.msra.mxu1 %v1020_v1 }
  0x78   :  { %2754 = vmatprep.subr.mxu0 %v3542_v12  ;;  %2773 = vmatprep.subr.mxu1 %v1027_v14 }
  0x79   :  { %2755 = vmatpush3.msra.mxu0 %v3542_v12  ;;  %2774 = vmatpush3.msra.mxu1 %v1027_v14 }
  0x7a   :  { %2756 = vmatprep.subr.mxu0 %v3563_v58  ;;  %2775 = vmatprep.subr.mxu1 %v1034_v19 }
  0x7b   :  { %2757 = vmatpush3.msra.mxu0 %v3563_v58  ;;  %2776 = vmatpush3.msra.mxu1 %v1034_v19 }
  0x7c   :  { %2758 = vmatprep.subr.mxu0 %v3575_v8  ;;  %2777 = vmatprep.subr.mxu1 %v1041_v39 }
  0x7d   :  { %2759 = vmatpush3.msra.mxu0 %v3575_v8  ;;  %2778 = vmatpush3.msra.mxu1 %v1041_v39 }
  0x7e   :  { %2760 = vmatprep.subr.mxu0 %v3585_v13  ;;  %2779 = vmatprep.subr.mxu1 %v1048_v30 }
  0x7f   :  { %2761 = vmatpush3.msra.mxu0 %v3585_v13  ;;  %2780 = vmatpush3.msra.mxu1 %v1048_v30 }
  0x80   :  { %2762 = vmatprep.mubr.f32.mxu0 %v3320_v48  ;;  %2781 = vmatprep.subr.mxu1 %v1055_v56  ;;  %v1523_v48 = vld [vmem:[%s3964_s4] sm:$0xff] }
  0x81   :  { %2792 = vmatprep.subr.mxu0 %v3465_v20  ;;  %2763 = vmatmul.mubr.f32.vlgmr.msra.gmra.mxu0 %v3373_v7  ;;  %v1527_v7 = vcombine.high %v1523_v48, %v1523_v48 }
  0x82   :  { %2782 = vmatpush3.msra.mxu1 %v1055_v56  ;;  %2793 = vmatpush3.msra.mxu0 %v3465_v20  ;;  %v1522_v20 = vld [vmem:[%s3961_s1 + $0x8] sm:$0x3f] }
  0x83   :  { %2783 = vmatprep.subr.mxu1 %v1062_v60  ;;  %2794 = vmatprep.subr.mxu0 %v3476_v61 }
  0x84   :  { %2784 = vmatpush3.msra.mxu1 %v1062_v60  ;;  %2795 = vmatpush3.msra.mxu0 %v3476_v61 }
  0x85   :  { %2785 = vmatprep.subr.mxu1 %v1069_v53  ;;  %2796 = vmatprep.subr.mxu0 %v3494_v3 }
  0x86   :  { %2786 = vmatpush3.msra.mxu1 %v1069_v53  ;;  %2797 = vmatpush3.msra.mxu0 %v3494_v3 }
  0x87   :  { %2787 = vmatprep.subr.mxu1 %v1076_v28  ;;  %2798 = vmatprep.subr.mxu0 %v3506_v11 }
  0x88   :  { %2788 = vmatpush3.msra.mxu1 %v1076_v28  ;;  %2789 = vmatprep.mubr.f32.mxu1 %v3247_v52 }
  0x89   :  { %2799 = vmatpush3.msra.mxu0 %v3506_v11  ;;  %2790 = vmatmul.mubr.f32.vlgmr.msra.gmra.mxu1 %v3332_v33 }
  0x8a   :  { %2800 = vmatprep.subr.mxu0 %v3520_v32  ;;  %2819 = vmatprep.subr.mxu1 %v3445_v17 }
  0x8b   :  { %2801 = vmatpush3.msra.mxu0 %v3520_v32  ;;  %2820 = vmatpush3.msra.mxu1 %v3445_v17 }
  0x8c   :  { %2802 = vmatprep.subr.mxu0 %v3534_v44  ;;  %2821 = vmatprep.subr.mxu1 %v3456_v59 }
  0x8d   :  { %2803 = vmatpush3.msra.mxu0 %v3534_v44  ;;  %2822 = vmatpush3.msra.mxu1 %v3456_v59 }
  0x8e   :  { %2804 = vmatprep.subr.mxu0 %v3548_v21  ;;  %2823 = vmatprep.subr.mxu1 %v3470_v26 }
  0x8f   :  { %2805 = vmatpush3.msra.mxu0 %v3548_v21  ;;  %2824 = vmatpush3.msra.mxu1 %v3470_v26 }
  0x90   :  { %2806 = vmatprep.subr.mxu0 %v3560_v35  ;;  %2825 = vmatprep.subr.mxu1 %v3481_v29 }
  0x91   :  { %2807 = vmatpush3.msra.mxu0 %v3560_v35  ;;  %2826 = vmatpush3.msra.mxu1 %v3481_v29 }
  0x92   :  { %2808 = vmatprep.subr.mxu0 %v3572_v62  ;;  %2827 = vmatprep.subr.mxu1 %v3491_v4 }
  0x93   :  { %2809 = vmatpush3.msra.mxu0 %v3572_v62  ;;  %2828 = vmatpush3.msra.mxu1 %v3491_v4 }
  0x94   :  { %2810 = vmatprep.subr.mxu0 %v3588_v46  ;;  %2829 = vmatprep.subr.mxu1 %v3503_v54 }
  0x95   :  { %2811 = vmatpush3.msra.mxu0 %v3588_v46  ;;  %2830 = vmatpush3.msra.mxu1 %v3503_v54 }
  0x96   :  { %2812 = vmatprep.subr.mxu0 %v3598_v22  ;;  %2831 = vmatprep.subr.mxu1 %v3514_v6 }
  0x97   :  { %2813 = vmatpush3.msra.mxu0 %v3598_v22  ;;  %2832 = vmatpush3.msra.mxu1 %v3514_v6 }
  0x98   :  { %2814 = vmatprep.subr.mxu0 %v3608_v27  ;;  %2833 = vmatprep.subr.mxu1 %v3528_v51 }
  0x99   :  { %2815 = vmatpush3.msra.mxu0 %v3608_v27  ;;  %2816 = vmatprep.mubr.f32.mxu0 %v3267_v55  ;;  %v1521_v55 = vld [vmem:[%s3961_s1] sm:$0xff] }
  0x9a   :  { %2834 = vmatpush3.msra.mxu1 %v3528_v51  ;;  %2817 = vmatmul.mubr.f32.vlgmr.msra.gmra.mxu0 %v3343_v42  ;;  %v1530_v42 = vsel %vm1528_vm2, %v1521_v55, 0 }
  0x9b   :  { %2835 = vmatprep.subr.mxu1 %v3542_v12  ;;  %2846 = vmatprep.subr.mxu0 %v3487_v36  ;;  %v3708_v61 = vand.u32 4294901760, %v1530_v42 }
  0x9c   :  { %2836 = vmatpush3.msra.mxu1 %v3542_v12  ;;  %2847 = vmatpush3.msra.mxu0 %v3487_v36  ;;  %v1538_v36 = vsel %vm1535_vm3, %v1527_v7, 0 }
  0x9d   :  { %2837 = vmatprep.subr.mxu1 %v3563_v58  ;;  %2848 = vmatprep.subr.mxu0 %v3499_v34 }
  0x9e   :  { %2838 = vmatpush3.msra.mxu1 %v3563_v58  ;;  %2849 = vmatpush3.msra.mxu0 %v3499_v34  ;;  %v3728_v34 = vand.u32 4294901760, %v1538_v36 }
  0x9f   :  { %2839 = vmatprep.subr.mxu1 %v3575_v8  ;;  %2850 = vmatprep.subr.mxu0 %v3517_v31 }
  0xa0   :  { %2840 = vmatpush3.msra.mxu1 %v3575_v8  ;;  %2851 = vmatpush3.msra.mxu0 %v3517_v31  ;;  %v1662_v31 = vsub.f32 %v1538_v36, %v3728_v34 }
  0xa1   :  { %2841 = vmatprep.subr.mxu1 %v3585_v13  ;;  %2852 = vmatprep.subr.mxu0 %v3531_v2 }
  0xa2   :  { %2842 = vmatpush3.msra.mxu1 %v3585_v13  ;;  %2843 = vmatprep.mubr.f32.mxu1 %v4005_v57  ;;  %v1533_v57 = vsel %vm1528_vm2, %v1522_v20, 0 }
  0xa3   :  { %2853 = vmatpush3.msra.mxu0 %v3531_v2  ;;  %2844 = vmatmul.mubr.f32.vlgmr.msra.gmra.mxu1 %v3353_v47  ;;  %v1536_v47 = vsel %vm1535_vm3, %v1523_v48, 0  ;;  %v3724_v3 = vand.u32 4294901760, %v1533_v57  ;;  %v1663_v2 = vand.u32 4294901760, %v1662_v31 }
  0xa4   :  { %2854 = vmatprep.subr.mxu0 %v3545_v0  ;;  %2873 = vmatprep.subr.mxu1 %v3445_v17 }
  0xa5   :  { %2855 = vmatpush3.msra.mxu0 %v3545_v0  ;;  %2874 = vmatpush3.msra.mxu1 %v3445_v17  ;;  %v3722_v17 = vsub.f32 %v1530_v42, %v3708_v61 }
  0xa6   :  { %2856 = vmatprep.subr.mxu0 %v3557_v50  ;;  %2875 = vmatprep.subr.mxu1 %v3456_v59 }
  0xa7   :  { %2857 = vmatpush3.msra.mxu0 %v3557_v50  ;;  %2876 = vmatpush3.msra.mxu1 %v3456_v59  ;;  %v3732_v59 = vand.u32 4294901760, %v1536_v47  ;;  %v3739_v11 = vand.u32 4294901760, %v3722_v17  ;;  %v1664_v50 = vsub.f32 %v1662_v31, %v1663_v2 }
  0xa8   :  { %2858 = vmatprep.subr.mxu0 %v3569_v49  ;;  %2877 = vmatprep.subr.mxu1 %v3470_v26 }
  0xa9   :  { %2859 = vmatpush3.msra.mxu0 %v3569_v49  ;;  %2878 = vmatpush3.msra.mxu1 %v3470_v26  ;;  %v3742_v26 = vsub.f32 %v1533_v57, %v3724_v3  ;;  %v1612_v32 = vsub.f32 %v3722_v17, %v3739_v11  ;;  %v1665_v40 = vand.u32 4294901760, %v1664_v50  ;;  %v2551_v49 = vld [vmem:[%s3962_s2] sm:$0xff] }
  0xaa   :  { %2860 = vmatprep.subr.mxu0 %v3582_v10  ;;  %2879 = vmatprep.subr.mxu1 %v3481_v29 }
  0xab   :  { %2861 = vmatpush3.msra.mxu0 %v3582_v10  ;;  %2880 = vmatpush3.msra.mxu1 %v3481_v29  ;;  %v1668_v29 = vsub.f32 %v1536_v47, %v3732_v59  ;;  %v3770_v0 = vand.u32 4294901760, %v1612_v32 }
  0xac   :  { %2862 = vmatprep.subr.mxu0 %v3594_v16  ;;  %2881 = vmatprep.subr.mxu1 %v3491_v4 }
  0xad   :  { %2863 = vmatpush3.msra.mxu0 %v3594_v16  ;;  %2882 = vmatpush3.msra.mxu1 %v3491_v4  ;;  %v3757_v4 = vand.u32 4294901760, %v3742_v26  ;;  %v1669_v44 = vand.u32 4294901760, %v1668_v29 }
  0xae   :  { %2864 = vmatprep.subr.mxu0 %v3605_v37  ;;  %2883 = vmatprep.subr.mxu1 %v3503_v54 }
  0xaf   :  { %2865 = vmatpush3.msra.mxu0 %v3605_v37  ;;  %2884 = vmatpush3.msra.mxu1 %v3503_v54  ;;  %v1524_v54 = vld [vmem:[%s3964_s4 + $0x8] sm:$0xf]  ;;  %v1670_v35 = vsub.f32 %v1668_v29, %v1669_v44 }
  0xb0   :  { %2866 = vmatprep.subr.mxu0 %v3615_v63  ;;  %2885 = vmatprep.subr.mxu1 %v3514_v6  ;;  %v1540_v21 = vsel %vm1535_vm3, %v1524_v54, 0 }
  0xb1   :  { %2867 = vmatpush3.msra.mxu0 %v3615_v63  ;;  %2886 = vmatpush3.msra.mxu1 %v3514_v6  ;;  %v1623_v6 = vsub.f32 %v3742_v26, %v3757_v4 }
  0xb2   :  { %2868 = vmatprep.subr.mxu0 %v3622_v43  ;;  %2887 = vmatprep.subr.mxu1 %v3528_v51 }
  0xb3   :  { %2869 = vmatpush3.msra.mxu0 %v3622_v43  ;;  %2870 = vmatprep.mubr.f32.mxu0 %v3247_v52  ;;  %v1624_v38 = vand.u32 4294901760, %v1623_v6 }
  0xb4   :  { %2888 = vmatpush3.msra.mxu1 %v3528_v51  ;;  %2871 = vmatmul.mubr.f32.vlgmr.msra.gmra.mxu0 %v3332_v33  ;;  %v3782_v51 = vand.u32 4294901760, %v1540_v21 }
  0xb5   :  { %2889 = vmatprep.subr.mxu1 %v3542_v12  ;;  %1573 = vmatprep.subr.mxu0 %v3728_v34 }
  0xb6   :  { %2890 = vmatpush3.msra.mxu1 %v3542_v12  ;;  %1575 = vmatpush1.msra.mxu0 %v3732_v59  ;;  %v1671_v12 = vand.u32 4294901760, %v1670_v35 }
  0xb7   :  { %2891 = vmatprep.subr.mxu1 %v3563_v58  ;;  %1608 = vmatprep.mubr.f32.mxu0 %v3995_v41 }
  0xb8   :  { %2892 = vmatpush3.msra.mxu1 %v3563_v58  ;;  %1614 = vmatmul.mubr.f32.vlgmr.msra.gmra.mxu0 %v3770_v0  ;;  %v2174_v58 = vsub.f32 %v1540_v21, %v3782_v51 }
  0xb9   :  { %2893 = vmatprep.subr.mxu1 %v3575_v8  ;;  %2897 = vmatprep.mubr.f32.mxu1 %v3247_v52 }
  0xba   :  { %2894 = vmatpush3.msra.mxu1 %v3575_v8  ;;  %1619 = vmatprep.mubr.f32.mxu0 %v3995_v41  ;;  %v2175_v52 = vand.u32 4294901760, %v2174_v58  ;;  %v2552_v8 = vld [vmem:[%s3962_s2 + $0x8] sm:$0x3f] }
  0xbb   :  { %2895 = vmatprep.subr.mxu1 %v3585_v13  ;;  %1752 = vmatprep.subr.mxu0 %v1662_v31 }
  0xbc   :  { %2896 = vmatpush3.msra.mxu1 %v3585_v13  ;;  %1625 = vmatmul.mubr.f32.gmra.mxu0 %v1624_v38 }
  0xbd   :  { %2898 = vmatmul.mubr.f32.vlgmr.msra.gmra.mxu1 %v3332_v33  ;;  %1666 = vmatprep.subr.mxu1 %v1665_v40  ;;  %v2176_v33 = vsub.f32 %v2174_v58, %v2175_v52 }
  0xbe   :  { %1672 = vmatpush1.msra.mxu1 %v1671_v12  ;;  %1705 = vmatprep.mubr.f32.mxu1 %v3995_v41 }
  0xbf   :  { %1755 = vmatpush1.msra.mxu0 %v1668_v29  ;;  %1836 = vmatprep.subr.mxu1 %v3728_v34  ;;  %v2177_v62 = vand.u32 4294901760, %v2176_v33 }
  0xc0   :  { %1788 = vmatprep.mubr.f32.mxu0 %v3995_v41  ;;  %1923 = vmatprep.subr.mxu0 %v1663_v2 }
  0xc1   :  { %1707 = vmatmul.mubr.f32.vlgmr.msra.gmra.mxu1 %v3708_v61  ;;  %1791 = vmatmul.mubr.f32.vlgmr.msra.gmra.mxu0 %v3722_v17 }
  0xc2   :  { %1838 = vmatpush1.msra.mxu1 %v3732_v59  ;;  %1712 = vmatprep.mubr.f32.mxu1 %v3995_v41 }
  0xc3   :  { %1796 = vmatprep.mubr.f32.mxu0 %v3995_v41  ;;  %1927 = vmatpush1.msra.mxu0 %v1669_v44 }
  0xc4   :  { %2006 = vmatprep.subr.mxu1 %v3728_v34  ;;  %2900 = vmatprep.subr.mxu0 %v3782_v51 }
  0xc5   :  { %1714 = vmatmul.mubr.f32.gmra.mxu1 %v3724_v3  ;;  %1799 = vmatmul.mubr.f32.gmra.mxu0 %v3742_v26 }
  0xc6   :  { %1871 = vmatprep.mubr.f32.mxu1 %v3995_v41  ;;  %1960 = vmatprep.mubr.f32.mxu0 %v3995_v41 }
  0xc7   :  { %2935 = vset.pattern.permute.xlu0 %v2975_v5 }
  0xc8   :  { %2555 = vperm.xlu0 %2935, %v2551_v49  }
  0xc9   :  { %1875 = vmatmul.mubr.f32.vlgmr.msra.gmra.mxu1 %v3739_v11  ;;  %1962 = vmatmul.mubr.f32.vlgmr.msra.gmra.mxu0 %v3708_v61 }
  0xca   :  { %2008 = vmatpush1.msra.mxu1 %v3732_v59  ;;  %1880 = vmatprep.mubr.f32.mxu1 %v3995_v41 }
  0xcb   :  { %1967 = vmatprep.mubr.f32.mxu0 %v3995_v41  ;;  %2901 = vmatpush3.msra.mxu0 %v3782_v51 }
  0xcc   :  { %2905 = vmatprep.subr.mxu1 %v2177_v62  ;;  %2910 = vmatprep.subr.mxu0 %v2174_v58 }
  0xcd   :  { %1884 = vmatmul.mubr.f32.gmra.mxu1 %v3757_v4  ;;  %1969 = vmatmul.mubr.f32.gmra.mxu0 %v3724_v3 }
  0xce   :  { %2041 = vmatprep.mubr.f32.mxu1 %v3995_v41  ;;  %2902 = vmatprep.mubr.f32.mxu0 %v3770_v0 }
  0xcf   :  { %2560 = vperm.xlu0 %2935, %v2552_v8  }
  0xd1   :  { %2043 = vmatmul.mubr.f32.vlgmr.msra.gmra.mxu1 %v3708_v61  ;;  %2903 = vmatmul.mubr.f32.vlgmr.msra.gmra.mxu0 %v1624_v38 }
  0xd2   :  { %2906 = vmatpush3.msra.mxu1 %v2177_v62  ;;  %2048 = vmatprep.mubr.f32.mxu1 %v3995_v41 }
  0xd3   :  { %2911 = vmatpush3.msra.mxu0 %v2174_v58  ;;  %2912 = vmatprep.mubr.f32.mxu0 %v3722_v17 }
  0xd4   :  { %2915 = vmatprep.subr.mxu1 %v3782_v51  ;;  %2920 = vmatprep.subr.mxu0 %v2175_v52 }
  0xd5   :  { %2050 = vmatmul.mubr.f32.gmra.mxu1 %v3724_v3  ;;  %2913 = vmatmul.mubr.f32.vlgmr.msra.gmra.mxu0 %v3742_v26 }
  0xd6   :  { %2907 = vmatprep.mubr.f32.mxu1 %v3708_v61  ;;  %2921 = vmatpush3.msra.mxu0 %v2175_v52 }
  0xd7   :  { %2922 = vmatprep.mubr.f32.mxu0 %v3708_v61 }
  0xd9   :  { %2908 = vmatmul.mubr.f32.vlgmr.msra.gmra.mxu1 %v3724_v3  ;;  %2923 = vmatmul.mubr.f32.vlgmr.msra.gmra.mxu0 %v3724_v3 }
  0xda   :  { %2916 = vmatpush3.msra.mxu1 %v3782_v51  ;;  %2917 = vmatprep.mubr.f32.mxu1 %v3739_v11 }
  0xdb   :  { %2925 = vmatprep.subr.mxu1 %v3782_v51 }
  0xdd   :  { %2918 = vmatmul.mubr.f32.vlgmr.msra.gmra.mxu1 %v3757_v4 }
  0xde   :  { %2926 = vmatpush3.msra.mxu1 %v3782_v51  ;;  %2927 = vmatprep.mubr.f32.mxu1 %v3708_v61 }
  0xe1   :  { %2928 = vmatmul.mubr.f32.vlgmr.msra.gmra.mxu1 %v3724_v3 }
  0xef   :  { %v184_v41 = vpop.f32.mrf.mxu0 }
  0xf1   :  { %v186_v1 = vpop.f32.mrf.mxu0 }
  0xf5   :  { %v387_v13 = vpop.f32.mrf.mxu1 }
  0xf6   :  { %v388_v35 = vadd.f32 %v387_v13, %v184_v41 }
  0xf7   :  { %v389_v14 = vpop.f32.mrf.mxu1 }
  0xf8   :  { %v390_v52 = vadd.f32 %v389_v14, %v186_v1 }
 0x103   :  { %v195_v9 = vpop.f32.mrf.mxu0 }
 0x105   :  { %v3840_v10 = vpop.f32.mrf.mxu0 }
 0x108   :  { %v515_v46 = vpop.f32.mrf.mxu0 }
 0x109   :  { %v394_v15 = vpop.f32.mrf.mxu1  ;;  %v516_v33 = vadd.f32 %v515_v46, %v388_v35 }
 0x10a   :  { %v517_v16 = vpop.f32.mrf.mxu0  ;;  %v395_v40 = vadd.f32 %v394_v15, %v195_v9 }
 0x10b   :  { %v396_v22 = vpop.f32.mrf.mxu1 }
 0x10e   :  { %v523_v19 = vpop.f32.mrf.mxu0 }
 0x110   :  { %v3842_v37 = vpop.f32.mrf.mxu0 }
 0x112   :  { %v621_v25 = vpop.f32.mrf.mxu1 }
 0x114   :  { %v623_v27 = vpop.f32.mrf.mxu1 }
 0x118   :  { %v3844_v45 = vpop.f32.mrf.mxu1 }
 0x11a   :  { %v3848_v30 = vpop.f32.mrf.mxu1 }
 0x124   :  { %v774_v39 = vpop.f32.mrf.mxu0 }
 0x126   :  { %v3846_v63 = vpop.f32.mrf.mxu0 }
 0x12a   :  { %v3850_v18 = vpop.f32.mrf.mxu0 }
 0x12c   :  { %v3854_v56 = vpop.f32.mrf.mxu0 }
 0x12e   :  { %v3852_v43 = vpop.f32.mrf.mxu1 }
 0x130   :  { %v3856_v24 = vpop.f32.mrf.mxu1 }
 0x134   :  { %v3860_v23 = vpop.f32.mrf.mxu1 }
 0x136   :  { %v3866_v55 = vpop.f32.mrf.mxu1 }
 0x141   :  { %v3858_v60 = vpop.f32.mrf.mxu0 }
 0x143   :  { %v3862_v53 = vpop.f32.mrf.mxu0  ;;  %v3887_v1 = vpop.permute.xlu0 %2555 }
 0x149   :  { %v3868_v48 = vpop.f32.mrf.mxu1 }
 0x14b   :  { %v3874_v20 = vpop.f32.mrf.mxu1 }
 0x15a   :  { %v3864_v28 = vpop.f32.mrf.mxu0 }
 0x15c   :  { %v3870_v42 = vpop.f32.mrf.mxu0 }
 0x163   :  { %v3878_v57 = vpop.f32.mrf.mxu1 }
 0x165   :  { %v3880_v17 = vpop.f32.mrf.mxu1 }
 0x174   :  { %v3872_v7 = vpop.f32.mrf.mxu0 }
 0x176   :  { %v3876_v61 = vpop.f32.mrf.mxu0 }
 0x177   :  { %4019 = vst [vmem:[#allocation5_spill] sm:$0xff] %v3876_v61 }
 0x178   :  { %v1615_v36 = vpop.f32.mrf.mxu0 }
 0x17a   :  { %v1617_v47 = vpop.f32.mrf.mxu0 }
 0x17c   :  { %v1626_v3 = vpop.f32.mrf.mxu0 }
 0x17d   :  { %v3882_v34 = vpop.f32.mrf.mxu1 }
 0x17e   :  { %4020 = vst [vmem:[#allocation6_spill] sm:$0xff] %v3882_v34  ;;  %v1628_v59 = vpop.f32.mrf.mxu0  ;;  %v518_v34 = vadd.f32 %v517_v16, %v390_v52 }
 0x17f   :  { %v3884_v11 = vpop.f32.mrf.mxu1 }
 0x180   :  { %4021 = vst [vmem:[#allocation7_spill] sm:$0xff] %v3884_v11 }
 0x181   :  { %v1708_v26 = vpop.f32.mrf.mxu1  ;;  %v1792_v31 = vpop.f32.mrf.mxu0 }
 0x182   :  { %v1709_v54 = vadd.f32 %v1708_v26, %v1615_v36  ;;  %v622_v36 = vadd.f32 %v621_v25, %v516_v33  ;;  %v1120_v33 = vadd.f32 %v3868_v48, %v3858_v60 }
 0x183   :  { %v1710_v29 = vpop.f32.mrf.mxu1  ;;  %v1794_v32 = vpop.f32.mrf.mxu0 }
 0x184   :  { %v1711_v6 = vadd.f32 %v1710_v29, %v1617_v47  ;;  %v1793_v51 = vadd.f32 %v1792_v31, %v1709_v54  ;;  %v397_v47 = vadd.f32 %v396_v22, %v3840_v10  ;;  %v524_v29 = vadd.f32 %v523_v19, %v395_v40 }
 0x185   :  { %v1715_v4 = vpop.f32.mrf.mxu1  ;;  %v1800_v2 = vpop.f32.mrf.mxu0  ;;  %v775_v9 = vadd.f32 %v774_v39, %v622_v36 }
 0x186   :  { %v1716_v38 = vadd.f32 %v1715_v4, %v1626_v3  ;;  %v1795_v49 = vadd.f32 %v1794_v32, %v1711_v6  ;;  %v624_v3 = vadd.f32 %v623_v27, %v518_v34  ;;  %v631_v46 = vadd.f32 %v3844_v45, %v524_v29 }
 0x187   :  { %v1717_v44 = vpop.f32.mrf.mxu1  ;;  %v1802_v0 = vpop.f32.mrf.mxu0  ;;  %v878_v25 = vadd.f32 %v3852_v43, %v775_v9  ;;  %v526_v22 = vadd.f32 %v3842_v37, %v397_v47  ;;  %v1223_v47 = vadd.f32 %v3864_v28, %v1120_v33 }
 0x188   :  { %v1718_v62 = vadd.f32 %v1717_v44, %v1628_v59  ;;  %v1801_v26 = vadd.f32 %v1800_v2, %v1716_v38  ;;  %v777_v16 = vadd.f32 %v3846_v63, %v624_v3  ;;  %v782_v19 = vadd.f32 %v3850_v18, %v631_v46 }
 0x189   :  { %v1876_v21 = vpop.f32.mrf.mxu1  ;;  %v1963_v50 = vpop.f32.mrf.mxu0 }
 0x18a   :  { %v1877_v5 = vadd.f32 %v1876_v21, %v1793_v51  ;;  %v1803_v14 = vadd.f32 %v1802_v0, %v1718_v62  ;;  %v880_v2 = vadd.f32 %v3856_v24, %v777_v16  ;;  %v633_v0 = vadd.f32 %v3848_v30, %v526_v22  ;;  %v2561_v51 = vpop.permute.xlu0 %2560 }
 0x18b   :  { %v1878_v12 = vpop.f32.mrf.mxu1  ;;  %v1965_v58 = vpop.f32.mrf.mxu0  ;;  %v885_v63 = vadd.f32 %v3860_v23, %v782_v19 }
 0x18c   :  { %v1879_v61 = vadd.f32 %v1878_v12, %v1795_v49  ;;  %v1964_v15 = vadd.f32 %v1963_v50, %v1877_v5  ;;  %v784_v18 = vadd.f32 %v3854_v56, %v633_v0 }
 0x18d   :  { %v1885_v8 = vpop.f32.mrf.mxu1  ;;  %v1970_v11 = vpop.f32.mrf.mxu0 }
 0x18e   :  { %v1886_v31 = vadd.f32 %v1885_v8, %v1801_v26  ;;  %v1966_v4 = vadd.f32 %v1965_v58, %v1879_v61  ;;  %v887_v23 = vadd.f32 %v3866_v55, %v784_v18  ;;  %v1114_v8 = vadd.f32 %v3874_v20, %v3862_v53 }
 0x18f   :  { %v1887_v41 = vpop.f32.mrf.mxu1  ;;  %v1972_v13 = vpop.f32.mrf.mxu0 }
 0x190   :  { %v1888_v27 = vadd.f32 %v1887_v41, %v1803_v14  ;;  %v1971_v54 = vadd.f32 %v1970_v11, %v1886_v31  ;;  %v1216_v60 = vadd.f32 %v3870_v42, %v1114_v8 }
 0x191   :  { %v2044_v59 = vpop.f32.mrf.mxu1  ;;  %v2904_v32 = vpop.f32.mrf.mxu0 }
 0x192   :  { %v2045_v10 = vadd.f32 %v2044_v59, %v1964_v15  ;;  %v1973_v50 = vadd.f32 %v1972_v13, %v1888_v27  ;;  %v1316_v15 = vadd.f32 %v3878_v57, %v1223_v47  ;;  %v1308_v59 = vadd.f32 %v3880_v17, %v1216_v60  ;;  %v4022_v57 = vld [vmem:[#allocation5_spill] sm:$0xff] }
 0x193   :  { %v2046_v39 = vpop.f32.mrf.mxu1  ;;  %v2128_v34 = vpop.f32.mrf.mxu0 }
 0x194   :  { %v2545_v45 = vmul.f32 %v2045_v10, %v878_v25  ;;  %v2047_v44 = vadd.f32 %v2046_v39, %v1966_v4  ;;  %v1429_v25 = vadd.f32 %v3872_v7, %v1316_v15  ;;  %v1423_v27 = vadd.f32 %v4022_v57, %v1308_v59 }
 0x195   :  { %v2051_v6 = vpop.f32.mrf.mxu1  ;;  %v2914_v21 = vpop.f32.mrf.mxu0 }
 0x196   :  { %v2546_v43 = vmul.f32 %v2047_v44, %v880_v2  ;;  %v3898_v61 = vadd.f32 %v3887_v1, %v2545_v45  ;;  %v2052_v37 = vadd.f32 %v2051_v6, %v1971_v54  ;;  %v4023_v54 = vld [vmem:[#allocation6_spill] sm:$0xff] }
 0x197   :  { %v2053_v35 = vpop.f32.mrf.mxu1  ;;  %v2294_v52 = vpop.f32.mrf.mxu0  ;;  %v1518_v17 = vadd.f32 %v4023_v54, %v1429_v25 }
 0x198   :  { %v3902_v24 = vadd.f32 %v3887_v1, %v2546_v43  ;;  %v2575_v30 = vmul.f32 %v3898_v61, %v3898_v61  ;;  %v2548_v11 = vmul.f32 %v2052_v37, %v885_v63  ;;  %v2054_v38 = vadd.f32 %v2053_v35, %v1973_v50  ;;  %v4024_v63 = vld [vmem:[#allocation7_spill] sm:$0xff] }
 0x199   :  { %v2909_v40 = vpop.f32.mrf.mxu1  ;;  %v2924_v20 = vpop.f32.mrf.mxu0  ;;  %v1512_v43 = vadd.f32 %v4024_v63, %v1423_v27 }
 0x19a   :  { %v2576_v12 = vmul.f32 %v3902_v24, %v3902_v24  ;;  %v2581_v58 = vmul.f32 %v2575_v30, %v3898_v61  ;;  %v3910_v56 = vadd.f32 %v2561_v51, %v2548_v11  ;;  %v2549_v49 = vmul.f32 %v2054_v38, %v887_v23 }
 0x19b   :  { %v2221_v5 = vadd.f32 %v2909_v40, %v2904_v32  ;;  %v2214_v62 = vpop.f32.mrf.mxu1  ;;  %v2457_v2 = vpop.f32.mrf.mxu0 }
 0x19c   :  { %v2582_v55 = vmul.f32 %v2576_v12, %v3902_v24  ;;  %v2587_v36 = vmul.f32 0.044715, %v2581_v58  ;;  %v2578_v26 = vmul.f32 %v3910_v56, %v3910_v56  ;;  %v3920_v29 = vadd.f32 %v2561_v51, %v2549_v49 }
 0x19d   :  { %v2302_v41 = vadd.f32 %v2914_v21, %v2221_v5  ;;  %v2215_v13 = vadd.f32 %v2214_v62, %v2128_v34  ;;  %v2919_v3 = vpop.f32.mrf.mxu1  ;;  %v2569_v5 = vmul.f32 0.5, %v3898_v61 }
 0x19e   :  { %v2588_v48 = vmul.f32 0.044715, %v2582_v55  ;;  %v2593_v9 = vadd.f32 %v2587_v36, %v3898_v61  ;;  %v2584_v53 = vmul.f32 %v2578_v26, %v3910_v56  ;;  %v2579_v31 = vmul.f32 %v3920_v29, %v3920_v29 }
 0x19f   :  { %v2295_v46 = vadd.f32 %v2294_v52, %v2215_v13  ;;  %v2384_v28 = vadd.f32 %v2919_v3, %v2302_v41  ;;  %v2375_v14 = vpop.f32.mrf.mxu1  ;;  %v2572_v3 = vmul.f32 0.5, %v3910_v56 }
 0x1a0   :  { %v2594_v32 = vadd.f32 %v2588_v48, %v3902_v24  ;;  %v2599_v16 = vmul.f32 0.7978846, %v2593_v9  ;;  %v2590_v42 = vmul.f32 0.044715, %v2584_v53  ;;  %v2585_v4 = vmul.f32 %v2579_v31, %v3920_v29 }
 0x1a1   :  { %v2464_v10 = vadd.f32 %v2924_v20, %v2384_v28  ;;  %v2376_v22 = vadd.f32 %v2375_v14, %v2295_v46  ;;  %v2929_v19 = vpop.f32.mrf.mxu1  ;;  %v2573_v48 = vmul.f32 0.5, %v3920_v29 }
 0x1a2   :  { %v2600_v39 = vmul.f32 0.7978846, %v2594_v32  ;;  %2937 = vtanh.f32 %v2599_v16  ;;  %v2596_v34 = vadd.f32 %v2590_v42, %v3910_v56  ;;  %v2591_v45 = vmul.f32 0.044715, %v2585_v4 }
 0x1a3   :  { %v2458_v44 = vadd.f32 %v2457_v2, %v2376_v22  ;;  %v2542_v0 = vadd.f32 %v2929_v19, %v2464_v10  ;;  %v2535_v6 = vpop.f32.mrf.mxu1 }
 0x1a4   :  { %2939 = vtanh.f32 %v2600_v39  ;;  %v2602_v7 = vmul.f32 0.7978846, %v2596_v34  ;;  %v2597_v37 = vadd.f32 %v2591_v45, %v3920_v29 }
 0x1a5   :  { %v2550_v21 = vmul.f32 %v2542_v0, %v1518_v17  ;;  %v2536_v18 = vadd.f32 %v2535_v6, %v2458_v44 }
 0x1a6   :  { %2941 = vtanh.f32 %v2602_v7  ;;  %v2603_v50 = vmul.f32 0.7978846, %v2597_v37 }
 0x1a7   :  { %v2568_v35 = vadd.f32 %v2561_v51, %v2550_v21  ;;  %v2547_v30 = vmul.f32 %v2536_v18, %v1512_v43  ;;  %v2570_v51 = vmul.f32 0.5, %v3902_v24 }
 0x1a8   :  { %2943 = vtanh.f32 %v2603_v50 }
 0x1a9   :  { %v2580_v11 = vmul.f32 %v2568_v35, %v2568_v35  ;;  %v2565_v23 = vadd.f32 %v3887_v1, %v2547_v30  ;;  %v2574_v20 = vmul.f32 0.5, %v2568_v35 }
 0x1ab   :  { %v2586_v38 = vmul.f32 %v2580_v11, %v2568_v35  ;;  %v2577_v40 = vmul.f32 %v2565_v23, %v2565_v23  ;;  %v2571_v28 = vmul.f32 0.5, %v2565_v23 }
 0x1ad   :  { %v2592_v12 = vmul.f32 0.044715, %v2586_v38  ;;  %v2583_v58 = vmul.f32 %v2577_v40, %v2565_v23 }
 0x1af   :  { %v2938_v52 = vpop.eup %2937  ;;  %v2598_v33 = vadd.f32 %v2592_v12, %v2568_v35  ;;  %v2589_v49 = vmul.f32 0.044715, %v2583_v58 }
 0x1b0   :  { %v2611_v62 = vadd.f32 1.0, %v2938_v52 }
 0x1b1   :  { %v2940_v8 = vpop.eup %2939  ;;  %v2604_v55 = vmul.f32 0.7978846, %v2598_v33  ;;  %v2595_v36 = vadd.f32 %v2589_v49, %v2565_v23 }
 0x1b2   :  { %v2612_v26 = vadd.f32 1.0, %v2940_v8  ;;  %v2617_v47 = vmul.f32 %v2611_v62, %v2569_v5 }
 0x1b3   :  { %v2942_v41 = vpop.eup %2941  ;;  %2945 = vtanh.f32 %v2604_v55  ;;  %v2601_v1 = vmul.f32 0.7978846, %v2595_v36 }
 0x1b4   :  { %v2618_v13 = vmul.f32 %v2612_v26, %v2570_v51  ;;  %2623 = vst [vmem:[%s3965_s5] sm:$0xff] %v2617_v47  ;;  %v2614_v60 = vadd.f32 1.0, %v2942_v41 }
 0x1b5   :  { %2947 = vtanh.f32 %v2601_v1  ;;  %v2944_v61 = vpop.eup %2943 }
 0x1b6   :  { %2624 = vst [vmem:[%s3965_s5 + $0x8] sm:$0xff] %v2618_v13  ;;  %v2620_v24 = vmul.f32 %v2614_v60, %v2572_v3  ;;  %v2615_v9 = vadd.f32 1.0, %v2944_v61 }
 0x1b8   :  { %2627 = vst [vmem:[%s3965_s5 + $0x18] sm:$0x3f] %v2620_v24  ;;  %v2621_v53 = vmul.f32 %v2615_v9, %v2573_v48 }
 0x1ba   :  { %2628 = vst [vmem:[%s3965_s5 + $0x20] sm:$0x3f] %v2621_v53 }
 0x1c0   :  { %v2946_v56 = vpop.eup %2945 }
 0x1c1   :  { %v2616_v15 = vadd.f32 1.0, %v2946_v56 }
 0x1c2   :  { %v2948_v31 = vpop.eup %2947 }
 0x1c3   :  { %v2622_v46 = vmul.f32 %v2616_v15, %v2574_v20  ;;  %v2613_v14 = vadd.f32 1.0, %v2948_v31 }
 0x1c5   :  { %2630 = vst.msk [vmem:[%s3965_s5 + $0x28] sm:$0x3f] %vm2629_vm4, %v2622_v46  ;;  %v2619_v29 = vmul.f32 %v2613_v14, %v2571_v28 }
 0x1c7   :  { %2626 = vst.msk [vmem:[%s3965_s5 + $0x10] sm:$0xff] %vm2625_vm5, %v2619_v29 }
 0x1c8   :  { %2635 = vsyncpa [#allocation3], 1 }

</bundles_post_ra>
